<compile_context>
chip_gen: v5e
topology: v5e:2x2
jax: 0.10.0
libtpu: 0.0.40
codegen_flags: <defaults>
</compile_context>

<pallas_src>
import functools

import jax
import jax.numpy as jnp
from jax import lax
from jax.experimental import pallas as pl
from jax.experimental.pallas import tpu as pltpu


# ---------------------------------------------------------------------------
# Packed path: hw % 128 == 0.  score (B, C, rows, 128), target (B, rows, 128).
# Outputs: three (n_split*B, C, 128) float32 partial-sum arrays.
# ---------------------------------------------------------------------------
def _dice_packed_kernel(score_ref, target_ref, inter_ref, z_ref, y_ref, *,
                        rows, tile_rows, chunk_rows, n_split, tiles_per_split,
                        n_row_tiles, ragged, apply_softmax):
    g = pl.program_id(0)
    j = pl.program_id(1)
    C = score_ref.shape[1]

    if n_split == 1:
        vj = j
    else:
        vj = (g % n_split) * tiles_per_split + j   # virtual row-tile index

    @pl.when(j == 0)
    def _init():
        inter_ref[...] = jnp.zeros_like(inter_ref)
        z_ref[...] = jnp.zeros_like(z_ref)
        y_ref[...] = jnp.zeros_like(y_ref)

    def chunk_partials(s, t, valid):
        # s: (C, k, 128) f32, t: (k, 128) i32, valid: None or (k, 128) bool
        if apply_softmax:                       # softmax over the class axis
            m = jnp.max(s, axis=0, keepdims=True)       # elementwise across C
            e = jnp.exp(s - m)                          # EUP
            denom = jnp.sum(e, axis=0, keepdims=True)
            s = e * pl.reciprocal(denom, approx=True)   # EUP
        if valid is not None:                   # only compiled for the ragged tile
            s = jnp.where(valid[None], s, 0.0)  # kills padded garbage / NaN
            t = jnp.where(valid, t, -1)         # -1 never matches a class id
        cls = lax.broadcasted_iota(jnp.int32, s.shape, 0)
        eq = t[None] == cls                                   # (C, k, 128)
        pi = jnp.sum(jnp.where(eq, s, 0.0), axis=1)           # (C, 128)
        pz = jnp.sum(s * s, axis=1)                           # (C, 128)
        py = jnp.sum(jnp.where(eq, 1.0, 0.0), axis=1)         # (C, 128)
        return pi, pz, py

    n_full = tile_rows // chunk_rows
    tail = tile_rows - n_full * chunk_rows

    def block_accum(masked):
        block_row0 = vj * tile_rows

        def partials(s, t, row_base):
            valid = None
            if masked:
                row = lax.broadcasted_iota(jnp.int32, t.shape, 0)
                valid = (row_base + row) < rows
            return chunk_partials(s, t, valid)

        if n_full == 1 and tail == 0:
            # single chunk == whole block
            pi, pz, py = partials(score_ref[0].astype(jnp.float32),
                                  target_ref[0], block_row0)
        else:
            zero = jnp.zeros((C, 128), jnp.float32)
            acc = (zero, zero, zero)

            def body(ci, carry):
                r0 = pl.multiple_of(ci * chunk_rows, 8)
                s = score_ref[0, :, pl.ds(r0, chunk_rows), :].astype(jnp.float32)
                t = target_ref[0, pl.ds(r0, chunk_rows), :]
                dpi, dpz, dpy = partials(s, t, block_row0 + r0)
                return carry[0] + dpi, carry[1] + dpz, carry[2] + dpy

            acc = lax.fori_loop(0, n_full, body, acc)
            if tail > 0:
                r0 = n_full * chunk_rows                      # static offset
                s = score_ref[0, :, pl.ds(r0, tail), :].astype(jnp.float32)
                t = target_ref[0, pl.ds(r0, tail), :]
                dpi, dpz, dpy = partials(s, t, block_row0 + r0)
                acc = (acc[0] + dpi, acc[1] + dpz, acc[2] + dpy)
            pi, pz, py = acc

        inter_ref[0] += pi
        z_ref[0] += pz
        y_ref[0] += py

    if not ragged:
        block_accum(False)
    else:
        @pl.when(vj != n_row_tiles - 1)
        def _fast():
            block_accum(False)

        @pl.when(vj == n_row_tiles - 1)
        def _tail():
            block_accum(True)


def _dice_sums_packed(inputs, target, apply_softmax, *,
                      score_block_bytes=4 * 1024 * 1024, max_block_rows=None):
    B, C, H, W = inputs.shape
    hw = H * W
    rows = hw // 128

    # Free reshapes only -- no transpose / upcast pass over HBM.
    score = inputs.reshape(B, C, rows, 128)
    tgt = target.reshape(B, rows, 128).astype(jnp.int32)

    itemsize = jnp.dtype(inputs.dtype).itemsize
    cap_rows = max(8, int(score_block_bytes // (C * 128 * itemsize)) // 8 * 8)
    if max_block_rows is not None:
        cap_rows = max(8, min(cap_rows, int(max_block_rows) // 8 * 8))

    # Compute-chunk size (rows per inner-loop step): keep C*chunk/8 f32 vregs small.
    ch_cap = max(8, min(64, (160 // C) // 8 * 8))

    if rows % 8 == 0:
        # chunk: largest multiple of 8 <= min(ch_cap, cap_rows) dividing rows
        ch = 8
        for d in range(max(8, min(ch_cap, cap_rows)), 7, -8):
            if rows % d == 0:
                ch = d
                break
        total_chunks = -(-rows // ch)
        max_cpt = max(1, cap_rows // ch)
        # v7x: when B == 1, force >= 2 row-tiles so both TensorCores get work.
        min_tiles = 2 if (B == 1 and total_chunks >= 2) else 1
        n_row_tiles = max(min_tiles, -(-total_chunks // max_cpt))
        cpt = -(-total_chunks // n_row_tiles)
        tile_rows = cpt * ch
        if n_row_tiles == 1:
            tile_rows = rows          # exact single block (tail chunk in-kernel)
    else:
        # rows not a multiple of 8 (hw = 128 * odd): keep it simple.
        if rows <= cap_rows:
            tile_rows = rows
            ch = rows
        else:
            tile_rows = cap_rows
            ch = max(8, min(ch_cap, cap_rows))
            while tile_rows % ch:
                ch -= 8

    ch = min(ch, tile_rows)
    n_row_tiles = -(-rows // tile_rows)
    ragged = (rows % tile_rows) != 0 and n_row_tiles > 1

    n_split = 2 if (B == 1 and n_row_tiles >= 2 and n_row_tiles % 2 == 0) else 1
    tiles_per_split = n_row_tiles // n_split

    if n_split == 1:
        score_map = lambda b, j: (b, 0, j, 0)
        tgt_map = lambda b, j: (b, j, 0)
        out_map = lambda b, j: (b, 0, 0)
    else:
        score_map = lambda g, j: (g // n_split, 0,
                                  (g % n_split) * tiles_per_split + j, 0)
        tgt_map = lambda g, j: (g // n_split,
                                (g % n_split) * tiles_per_split + j, 0)
        out_map = lambda g, j: (g, 0, 0)

    kernel = functools.partial(
        _dice_packed_kernel, rows=rows, tile_rows=tile_rows, chunk_rows=ch,
        n_split=n_split, tiles_per_split=tiles_per_split,
        n_row_tiles=n_row_tiles, ragged=ragged, apply_softmax=apply_softmax)

    G = n_split * B
    out_shapes = tuple(jax.ShapeDtypeStruct((G, C, 128), jnp.float32)
                       for _ in range(3))

    return pl.pallas_call(
        kernel,
        out_shape=out_shapes,
        grid_spec=pltpu.PrefetchScalarGridSpec(
            num_scalar_prefetch=0,
            grid=(G, tiles_per_split),                     # reduction axis last
            in_specs=[
                pl.BlockSpec((1, C, tile_rows, 128), score_map),
                pl.BlockSpec((1, tile_rows, 128), tgt_map),
            ],
            out_specs=[
                pl.BlockSpec((1, C, 128), out_map),
                pl.BlockSpec((1, C, 128), out_map),
                pl.BlockSpec((1, C, 128), out_map),
            ],
        ),
        compiler_params=pltpu.CompilerParams(
            dimension_semantics=("parallel", "arbitrary")),
    )(score, tgt)


# ---------------------------------------------------------------------------
# Flat fallback path: hw % 128 != 0.  score (B, C, hw), target (B, 1, hw).
# ---------------------------------------------------------------------------
def _dice_flat_kernel(score_ref, target_ref, inter_ref, z_ref, y_ref, *,
                      hw, ragged, apply_softmax):
    j = pl.program_id(1)

    @pl.when(j == 0)
    def _init():
        inter_ref[...] = jnp.zeros_like(inter_ref)
        z_ref[...] = jnp.zeros_like(z_ref)
        y_ref[...] = jnp.zeros_like(y_ref)

    def accum(masked):
        s = score_ref[0].astype(jnp.float32)        # (C, tile_n)
        t = target_ref[0]                           # (1, tile_n) int32
        tile_n = s.shape[1]
        if apply_softmax:
            m = jnp.max(s, axis=0, keepdims=True)
            e = jnp.exp(s - m)
            denom = jnp.sum(e, axis=0, keepdims=True)
            s = e * pl.reciprocal(denom, approx=True)
        if masked:                                  # only on the ragged last tile
            lane = lax.broadcasted_iota(jnp.int32, t.shape, 1)
            valid = (j * tile_n + lane) < hw
            s = jnp.where(valid, s, 0.0)
            t = jnp.where(valid, t, -1)
        cls = lax.broadcasted_iota(jnp.int32, s.shape, 0)
        eq = t == cls                                              # (C, tile_n)
        inter_ref[0] += jnp.sum(jnp.where(eq, s, 0.0), axis=1, keepdims=True)
        z_ref[0] += jnp.sum(s * s, axis=1, keepdims=True)
        y_ref[0] += jnp.sum(jnp.where(eq, 1.0, 0.0), axis=1, keepdims=True)

    if not ragged:
        accum(False)
    else:
        last = pl.num_programs(1) - 1

        @pl.when(j != last)
        def _fast():
            accum(False)

        @pl.when(j == last)
        def _tail():
            accum(True)


def _dice_sums_flat(inputs, target, apply_softmax, *,
                    score_block_bytes=4 * 1024 * 1024, max_tile_n=8192):
    B, C, H, W = inputs.shape
    hw = H * W
    score = inputs.reshape(B, C, hw)
    tgt = target.reshape(B, 1, hw).astype(jnp.int32)

    itemsize = jnp.dtype(inputs.dtype).itemsize
    cap = max(128, min(int(max_tile_n),
                       int(score_block_bytes // (C * itemsize)) // 128 * 128))
    tile_n = hw if hw <= cap else cap
    n_tiles = -(-hw // tile_n)
    ragged = (hw % tile_n) != 0 and n_tiles > 1

    kernel = functools.partial(_dice_flat_kernel, hw=hw, ragged=ragged,
                               apply_softmax=apply_softmax)
    out_shapes = tuple(jax.ShapeDtypeStruct((B, C, 1), jnp.float32)
                       for _ in range(3))

    return pl.pallas_call(
        kernel,
        out_shape=out_shapes,
        grid_spec=pltpu.PrefetchScalarGridSpec(
            num_scalar_prefetch=0,
            grid=(B, n_tiles),
            in_specs=[
                pl.BlockSpec((1, C, tile_n), lambda b, j: (b, 0, j)),
                pl.BlockSpec((1, 1, tile_n), lambda b, j: (b, 0, j)),
            ],
            out_specs=[
                pl.BlockSpec((1, C, 1), lambda b, j: (b, 0, 0)),
                pl.BlockSpec((1, C, 1), lambda b, j: (b, 0, 0)),
                pl.BlockSpec((1, C, 1), lambda b, j: (b, 0, 0)),
            ],
        ),
        compiler_params=pltpu.CompilerParams(
            dimension_semantics=("parallel", "arbitrary")),
    )(score, tgt)


# ---------------------------------------------------------------------------
# Public entry point -- matches DiceLoss.forward(inputs, target, weight, softmax)
# ---------------------------------------------------------------------------
def dice_loss(inputs, target, n_classes, weight=None, softmax=False,
              max_tile_n=8192, max_block_rows=None):
    B, C, H, W = inputs.shape
    assert C == n_classes, "channel dim must equal n_classes"
    hw = H * W

    if hw % 128 == 0:
        inter, z, y = _dice_sums_packed(inputs, target, softmax,
                                        max_block_rows=max_block_rows)
    else:
        inter, z, y = _dice_sums_flat(inputs, target, softmax,
                                      max_tile_n=max_tile_n)

    # Combine the tiny per-block partials and finish the scalar dice math.
    intersect = jnp.sum(inter, axis=(0, 2))    # (C,)
    z_sum = jnp.sum(z, axis=(0, 2))
    y_sum = jnp.sum(y, axis=(0, 2))

    smooth = 1e-5
    dice = 1.0 - (2.0 * intersect + smooth) / (z_sum + y_sum + smooth)

    if weight is None:
        weight = jnp.ones((n_classes,), jnp.float32)
    else:
        weight = jnp.asarray(weight, jnp.float32)

    # TODO(synk): class_wise_dice bookkeeping (host-side .item() logging in the
    # PyTorch module) is not part of the returned loss and is omitted.
    return jnp.sum(dice * weight) / n_classes


def _dice_loss_ref(inputs, target, n_classes, weight=None, softmax=False):
    """Plain-JAX reference mirroring the PyTorch module."""
    inputs = inputs.astype(jnp.float32)
    if softmax:
        inputs = jax.nn.softmax(inputs, axis=1)
    oh = jax.nn.one_hot(target, n_classes, axis=1, dtype=jnp.float32)  # (B,C,H,W)
    if weight is None:
        weight = [1.0] * n_classes
    smooth = 1e-5
    loss = 0.0
    for i in range(n_classes):
        s = inputs[:, i]
        t = oh[:, i]
        intersect = jnp.sum(s * t)
        y = jnp.sum(t * t)
        zz = jnp.sum(s * s)
        d = 1.0 - (2.0 * intersect + smooth) / (zz + y + smooth)
        loss = loss + d * weight[i]
    return loss / n_classes


if __name__ == "__main__":
    key = jax.random.PRNGKey(0)
    k1, k2, k3, k4, k5, k6, k7, k8 = jax.random.split(key, 8)

    # 1) packed path, single tile, no softmax (module default)
    B, C, H, W = 2, 4, 16, 16
    inputs = jax.random.normal(k1, (B, C, H, W), dtype=jnp.float32)
    target = jax.random.randint(k2, (B, H, W), 0, C, dtype=jnp.int32)
    out = dice_loss(inputs, target, n_classes=C, softmax=False)
    jax.block_until_ready(out)
    ref = _dice_loss_ref(inputs, target, n_classes=C, softmax=False)
    assert jnp.allclose(out, ref, rtol=1e-4, atol=1e-5), (out, ref)

    # 2) packed path with softmax (approx reciprocal -> slightly looser tol)
    out_sm = dice_loss(inputs, target, n_classes=C, softmax=True)
    jax.block_until_ready(out_sm)
    ref_sm = _dice_loss_ref(inputs, target, n_classes=C, softmax=True)
    assert jnp.allclose(out_sm, ref_sm, rtol=2e-3, atol=1e-4), (out_sm, ref_sm)

    # 3) bf16 scores streamed in native dtype (kernel upcasts inside VMEM)
    out_bf = dice_loss(inputs.astype(jnp.bfloat16), target, n_classes=C,
                       softmax=False)
    jax.block_until_ready(out_bf)
    ref_bf = _dice_loss_ref(inputs.astype(jnp.bfloat16), target, n_classes=C,
                            softmax=False)
    assert jnp.allclose(out_bf, ref_bf, rtol=1e-4, atol=1e-5), (out_bf, ref_bf)

    # 4) H*W not a multiple of 128 -> flat fallback path with gated tail mask
    Hu, Wu = 20, 20
    inputs_u = jax.random.normal(k3, (B, C, Hu, Wu), dtype=jnp.float32)
    target_u = jax.random.randint(k4, (B, Hu, Wu), 0, C, dtype=jnp.int32)
    out_u = dice_loss(inputs_u, target_u, n_classes=C, softmax=True,
                      max_tile_n=128)
    jax.block_until_ready(out_u)
    ref_u = _dice_loss_ref(inputs_u, target_u, n_classes=C, softmax=True)
    assert jnp.allclose(out_u, ref_u, rtol=2e-3, atol=1e-4), (out_u, ref_u)

    # 5) B == 1: packed path with the 2-way row split (v7x dual-TC axis)
    Hs, Ws = 64, 64
    inputs_s = jax.random.normal(k5, (1, C, Hs, Ws), dtype=jnp.float32)
    target_s = jax.random.randint(k6, (1, Hs, Ws), 0, C, dtype=jnp.int32)
    out_s = dice_loss(inputs_s, target_s, n_classes=C, softmax=True,
                      max_block_rows=16)
    jax.block_until_ready(out_s)
    ref_s = _dice_loss_ref(inputs_s, target_s, n_classes=C, softmax=True)
    assert jnp.allclose(out_s, ref_s, rtol=2e-3, atol=1e-4), (out_s, ref_s)

    # 6) packed path with multiple row-tiles, inner chunk loop + masked tail
    Cr, Hr, Wr = 3, 64, 80
    inputs_r = jax.random.normal(k7, (B, Cr, Hr, Wr), dtype=jnp.float32)
    target_r = jax.random.randint(k8, (B, Hr, Wr), 0, Cr, dtype=jnp.int32)
    out_r = dice_loss(inputs_r, target_r, n_classes=Cr, softmax=False,
                      max_block_rows=16)
    jax.block_until_ready(out_r)
    ref_r = _dice_loss_ref(inputs_r, target_r, n_classes=Cr, softmax=False)
    assert jnp.allclose(out_r, ref_r, rtol=1e-4, atol=1e-5), (out_r, ref_r)

    print("KERNEL_OK")
</pallas_src>

<mosaic_0001>
module attributes {stable_mosaic.version = 11 : i64} {
  func.func @_dice_packed_kernel(%arg0: i32, %arg1: i32, %arg2: memref<1x4x2x128xf32, #tpu.memory_space<vmem>>, %arg3: memref<1x2x128xi32, #tpu.memory_space<vmem>>, %arg4: memref<1x4x128xf32, #tpu.memory_space<vmem>>, %arg5: memref<1x4x128xf32, #tpu.memory_space<vmem>>, %arg6: memref<1x4x128xf32, #tpu.memory_space<vmem>>) attributes {dimension_semantics = [#tpu.dimension_semantics<parallel>, #tpu.dimension_semantics<arbitrary>], iteration_bounds = array<i64: 2, 1>, scalar_prefetch = 0 : i64, scratch_operands = 0 : i64, tpu.core_type = #tpu.core_type<tc>, window_params = [{transform_indices = @transform_0, window_bounds = array<i64: 1, 4, 2, 128>}, {transform_indices = @transform_1, window_bounds = array<i64: 1, 2, 128>}, {transform_indices = @transform_2, window_bounds = array<i64: 1, 4, 128>}, {transform_indices = @transform_3, window_bounds = array<i64: 1, 4, 128>}, {transform_indices = @transform_4, window_bounds = array<i64: 1, 4, 128>}]} {
    %c0_i32 = arith.constant 0 : i32
    %0 = arith.cmpi eq, %arg1, %c0_i32 : i32
    %1 = arith.extui %0 : i1 to i32
    %c0_i32_0 = arith.constant 0 : i32
    %2 = arith.cmpi ne, %1, %c0_i32_0 : i32
    scf.if %2 {
      %cst_30 = arith.constant 0.000000e+00 : f32
      %38 = vector.broadcast %cst_30 : f32 to vector<1x4x128xf32>
      %c0_31 = arith.constant 0 : index
      %c0_32 = arith.constant 0 : index
      %c0_33 = arith.constant 0 : index
      %39 = vector.load %arg4[%c0_31, %c0_32, %c0_33] : memref<1x4x128xf32, #tpu.memory_space<vmem>>, vector<1x4x128xf32>
      tpu.vector_store %arg4[%c0_31, %c0_32, %c0_33], %38 {strides = array<i32>} : memref<1x4x128xf32, #tpu.memory_space<vmem>>, vector<1x4x128xf32>,
      %cst_34 = arith.constant 0.000000e+00 : f32
      %40 = vector.broadcast %cst_34 : f32 to vector<1x4x128xf32>
      %c0_35 = arith.constant 0 : index
      %c0_36 = arith.constant 0 : index
      %c0_37 = arith.constant 0 : index
      %41 = vector.load %arg5[%c0_35, %c0_36, %c0_37] : memref<1x4x128xf32, #tpu.memory_space<vmem>>, vector<1x4x128xf32>
      tpu.vector_store %arg5[%c0_35, %c0_36, %c0_37], %40 {strides = array<i32>} : memref<1x4x128xf32, #tpu.memory_space<vmem>>, vector<1x4x128xf32>,
      %cst_38 = arith.constant 0.000000e+00 : f32
      %42 = vector.broadcast %cst_38 : f32 to vector<1x4x128xf32>
      %c0_39 = arith.constant 0 : index
      %c0_40 = arith.constant 0 : index
      %c0_41 = arith.constant 0 : index
      %43 = vector.load %arg6[%c0_39, %c0_40, %c0_41] : memref<1x4x128xf32, #tpu.memory_space<vmem>>, vector<1x4x128xf32>
      tpu.vector_store %arg6[%c0_39, %c0_40, %c0_41], %42 {strides = array<i32>} : memref<1x4x128xf32, #tpu.memory_space<vmem>>, vector<1x4x128xf32>,
    } else {
    }
    %c0 = arith.constant 0 : index
    %c0_1 = arith.constant 0 : index
    %c0_2 = arith.constant 0 : index
    %c0_3 = arith.constant 0 : index
    %3 = vector.load %arg2[%c0, %c0_1, %c0_2, %c0_3] : memref<1x4x2x128xf32, #tpu.memory_space<vmem>>, vector<1x4x2x128xf32>
    %4 = vector.shape_cast %3 : vector<1x4x2x128xf32> to vector<4x2x128xf32>
    %c0_4 = arith.constant 0 : index
    %c0_5 = arith.constant 0 : index
    %c0_6 = arith.constant 0 : index
    %5 = vector.load %arg3[%c0_4, %c0_5, %c0_6] : memref<1x2x128xi32, #tpu.memory_space<vmem>>, vector<1x2x128xi32>
    %6 = vector.shape_cast %5 : vector<1x2x128xi32> to vector<2x128xi32>
    %7 = tpu.iota {dimensions = array<i32: 0>} : vector<4x2x128xi32>
    %8 = vector.shape_cast %6 : vector<2x128xi32> to vector<1x2x128xi32>
    %9 = vector.broadcast %8 : vector<1x2x128xi32> to vector<4x2x128xi32>
    %10 = arith.cmpi eq, %9, %7 : vector<4x2x128xi32>
    %cst = arith.constant 0.000000e+00 : f32
    %11 = vector.broadcast %cst : f32 to vector<4x2x128xf32>
    %12 = arith.select %10, %4, %11 : vector<4x2x128xi1>, vector<4x2x128xf32>
    %cst_7 = arith.constant dense<0.000000e+00> : vector<4x128xf32>
    %13 = vector.multi_reduction <add>, %12, %cst_7 [1] : vector<4x2x128xf32> to vector<4x128xf32>
    %14 = arith.mulf %4, %4 : vector<4x2x128xf32>
    %cst_8 = arith.constant dense<0.000000e+00> : vector<4x128xf32>
    %15 = vector.multi_reduction <add>, %14, %cst_8 [1] : vector<4x2x128xf32> to vector<4x128xf32>
    %cst_9 = arith.constant 1.000000e+00 : f32
    %cst_10 = arith.constant 0.000000e+00 : f32
    %16 = vector.broadcast %cst_9 : f32 to vector<4x2x128xf32>
    %17 = vector.broadcast %cst_10 : f32 to vector<4x2x128xf32>
    %18 = arith.select %10, %16, %17 : vector<4x2x128xi1>, vector<4x2x128xf32>
    %cst_11 = arith.constant dense<0.000000e+00> : vector<4x128xf32>
    %19 = vector.multi_reduction <add>, %18, %cst_11 [1] : vector<4x2x128xf32> to vector<4x128xf32>
    %c0_12 = arith.constant 0 : index
    %c0_13 = arith.constant 0 : index
    %c0_14 = arith.constant 0 : index
    %20 = vector.load %arg4[%c0_12, %c0_13, %c0_14] : memref<1x4x128xf32, #tpu.memory_space<vmem>>, vector<1x4x128xf32>
    %21 = vector.shape_cast %20 : vector<1x4x128xf32> to vector<4x128xf32>
    %22 = arith.addf %21, %13 : vector<4x128xf32>
    %c0_15 = arith.constant 0 : index
    %c0_16 = arith.constant 0 : index
    %c0_17 = arith.constant 0 : index
    %23 = vector.load %arg4[%c0_15, %c0_16, %c0_17] : memref<1x4x128xf32, #tpu.memory_space<vmem>>, vector<1x4x128xf32>
    %24 = vector.shape_cast %23 : vector<1x4x128xf32> to vector<4x128xf32>
    %25 = vector.shape_cast %22 : vector<4x128xf32> to vector<1x4x128xf32>
    tpu.vector_store %arg4[%c0_15, %c0_16, %c0_17], %25 {strides = array<i32>} : memref<1x4x128xf32, #tpu.memory_space<vmem>>, vector<1x4x128xf32>,
    %c0_18 = arith.constant 0 : index
    %c0_19 = arith.constant 0 : index
    %c0_20 = arith.constant 0 : index
    %26 = vector.load %arg5[%c0_18, %c0_19, %c0_20] : memref<1x4x128xf32, #tpu.memory_space<vmem>>, vector<1x4x128xf32>
    %27 = vector.shape_cast %26 : vector<1x4x128xf32> to vector<4x128xf32>
    %28 = arith.addf %27, %15 : vector<4x128xf32>
    %c0_21 = arith.constant 0 : index
    %c0_22 = arith.constant 0 : index
    %c0_23 = arith.constant 0 : index
    %29 = vector.load %arg5[%c0_21, %c0_22, %c0_23] : memref<1x4x128xf32, #tpu.memory_space<vmem>>, vector<1x4x128xf32>
    %30 = vector.shape_cast %29 : vector<1x4x128xf32> to vector<4x128xf32>
    %31 = vector.shape_cast %28 : vector<4x128xf32> to vector<1x4x128xf32>
    tpu.vector_store %arg5[%c0_21, %c0_22, %c0_23], %31 {strides = array<i32>} : memref<1x4x128xf32, #tpu.memory_space<vmem>>, vector<1x4x128xf32>,
    %c0_24 = arith.constant 0 : index
    %c0_25 = arith.constant 0 : index
    %c0_26 = arith.constant 0 : index
    %32 = vector.load %arg6[%c0_24, %c0_25, %c0_26] : memref<1x4x128xf32, #tpu.memory_space<vmem>>, vector<1x4x128xf32>
    %33 = vector.shape_cast %32 : vector<1x4x128xf32> to vector<4x128xf32>
    %34 = arith.addf %33, %19 : vector<4x128xf32>
    %c0_27 = arith.constant 0 : index
    %c0_28 = arith.constant 0 : index
    %c0_29 = arith.constant 0 : index
    %35 = vector.load %arg6[%c0_27, %c0_28, %c0_29] : memref<1x4x128xf32, #tpu.memory_space<vmem>>, vector<1x4x128xf32>
    %36 = vector.shape_cast %35 : vector<1x4x128xf32> to vector<4x128xf32>
    %37 = vector.shape_cast %34 : vector<4x128xf32> to vector<1x4x128xf32>
    tpu.vector_store %arg6[%c0_27, %c0_28, %c0_29], %37 {strides = array<i32>} : memref<1x4x128xf32, #tpu.memory_space<vmem>>, vector<1x4x128xf32>,
    return
  }
  func.func @transform_0(%arg0: i32, %arg1: i32) -> (i32, i32, i32, i32) {
    %c0_i32 = arith.constant 0 : i32
    %c0_i32_0 = arith.constant 0 : i32
    %c0_i32_1 = arith.constant 0 : i32
    return %arg0, %c0_i32, %arg1, %c0_i32_0 : i32, i32, i32, i32
  }
  func.func @transform_1(%arg0: i32, %arg1: i32) -> (i32, i32, i32) {
    %c0_i32 = arith.constant 0 : i32
    %c0_i32_0 = arith.constant 0 : i32
    return %arg0, %arg1, %c0_i32 : i32, i32, i32
  }
  func.func @transform_2(%arg0: i32, %arg1: i32) -> (i32, i32, i32) {
    %c0_i32 = arith.constant 0 : i32
    %c0_i32_0 = arith.constant 0 : i32
    %c0_i32_1 = arith.constant 0 : i32
    return %arg0, %c0_i32, %c0_i32_0 : i32, i32, i32
  }
  func.func @transform_3(%arg0: i32, %arg1: i32) -> (i32, i32, i32) {
    %c0_i32 = arith.constant 0 : i32
    %c0_i32_0 = arith.constant 0 : i32
    %c0_i32_1 = arith.constant 0 : i32
    return %arg0, %c0_i32, %c0_i32_0 : i32, i32, i32
  }
  func.func @transform_4(%arg0: i32, %arg1: i32) -> (i32, i32, i32) {
    %c0_i32 = arith.constant 0 : i32
    %c0_i32_0 = arith.constant 0 : i32
    %c0_i32_1 = arith.constant 0 : i32
    return %arg0, %c0_i32, %c0_i32_0 : i32, i32, i32
  }
}

</mosaic_0001>

<bundles_post_ra>
// kernel: tpu_custom_call.1
= control target key start
LH: loop header
LB: loop body
LE: loop exit
PB: predicated region body
PF: predicated region fallthrough
CT: control target
= control target key end

     0   :  { %s1271_s0 = inlined_call_operand.hbm [shape: f32[2,4,2,128], index: 0, kind: input, shape index: {}]   ;;  %s1272_s1 = inlined_call_operand.hbm [shape: s32[2,2,128], index: 1, kind: input, shape index: {}]   ;;  %s1273_s2 = inlined_call_operand.hbm [shape: f32[2,4,128], index: 2, kind: output, shape index: {0}]   ;;  %s1274_s3 = inlined_call_operand.hbm [shape: f32[2,4,128], index: 3, kind: output, shape index: {1}]   ;;  %s1275_s4 = inlined_call_operand.hbm [shape: f32[2,4,128], index: 4, kind: output, shape index: {2}]  }
   0x1   :  { %1278 = sst [smem:[#allocation16_spill]] %s1271_s0 }
   0x2   :  { %10 = vsyncpa [#allocation3], 0 }
   0x3   :  { %12 = vsyncpa [#allocation3 + $0x1], 0 }
   0x4   :  { %13 = vsyncpa [#allocation6], 0 }
   0x5   :  { %15 = vsyncpa [#allocation6 + $0x1], 0 }
   0x6   :  { %16 = vsyncpa [#allocation4], 0 }
   0x7   :  { %18 = vsyncpa [#allocation4 + $0x1], 0 }
   0x8   :  { %19 = vsyncpa [#allocation9], 0 }
   0x9   :  { %21 = vsyncpa [#allocation9 + $0x1], 0  ;;  %s1003_s15 = smov 0   ;;  %s1005_s16 = smov 0  }
   0xa   :  { %s1007_s17 = smov 0   ;;  %s1009_s18 = smov 0  }
   0xb   :  { %s1011_s19 = smov 0   ;;  %s1013_s20 = smov 0  }
   0xc LB: > { %s1034_s21 = sadd.s32 4294967295, %s973_s20   ;;  %s1276_s22 = sadd.s32 4294967294, %s973_s20   ;;  %s973_s20 = sphi %s1013_s20, %s27_s20   ;;  %s969_s19 = sphi %s1011_s19, %s1292_s19   ;;  %s965_s18 = sphi %s1009_s18, %s1291_s18   ;;  %s961_s17 = sphi %s1007_s17, %s1290_s17   ;;  %s957_s16 = sphi %s1005_s16, %s1289_s16   ;;  %s953_s15 = sphi %s1003_s15, %s1288_s15  }
   0xd   : > { %s39_s23 = sadd.s32 1, %s969_s19  ;;  %s48_s24 = sadd.s32 1, %s961_s17 }
   0xe   : > { %p41_p0 = scmp.ge.s32.totalorder %s39_s23, 2  ;;  %p55_p1 = scmp.ne.s32.totalorder %s961_s17, %s957_s16 }
   0xf   : > { %p56_p2 = scmp.eq.s32.totalorder %s973_s20, 0  ;;  %p61_p3 = scmp.ne.s32.totalorder %s957_s16, %s953_s15 }
  0x10   : > { %s1294_s23 = smov (%p41_p0, %s39_s23), 0  ;;  %p62_p5 = scmp.eq.s32.totalorder %s1034_s21, 0 }
  0x11   : > { %1279 = sst [smem:[#allocation15_spill]] %s1294_s23  ;;  %p1046_p4 = por %p56_p2, %p55_p1 }
  0x12   : > { %s43_s26 = ssub.s32 %s969_s19, %s1294_s23  ;;  %p113_p6 = scmp.eq.s32.totalorder %s1034_s21, 1 }
  0x13   : > { %p46_p7 = scmp.eq.s32.totalorder %s43_s26, 0  ;;  %p1054_p8 = por %p62_p5, %p61_p3 }
  0x14   : > { %p1058_p9 = por %p113_p6, %p55_p1  ;;  %p119_p10 = scmp.eq.s32.totalorder %s1276_s22, 1 }
  0x15   : > { %s1065_s29 = scalar_select %p46_p7, %s961_s17, %s48_s24  }
  0x16   : > { %p1067_p11 = por %p119_p10, %p61_p3  ;;  %p666_p12 = scmp.ge.s32.totalorder %s973_s20, 2 }
  0x17   : > { %p714_p13 = scmp.lt.s32.totalorder %s973_s20, 2  ;;  %s191_s5 = sand.u32 1, %s961_s17  }
  0x18   : > { %s667_s6 = sshll.u32 %s191_s5, 3  ;;  %s686_s7 = sshll.u32 %s969_s19, 3 }
  0x19   : > { %s1284_s0 = sld [smem:[#allocation16_spill]]  ;;  %s195_s11 = scalar_lea.vmem [#allocation2], %s667_s6 }
  0x1a   : > { %s204_s12 = sshll.u32 %s195_s11, 4  ;;  %p1080_p0 = pnand %p714_p13, %p1046_p4  ;;  %s205_s12 = int_to_ptr.vmem [resolvable:$true] %s204_s12 }
  0x1b   : > { %p672_p1 = scmp.ge.s32.totalorder %s973_s20, 1  ;;  %s192_s24 = scalar_lea.sflag [#allocation3], %s191_s5 }
  0x1c   : > { %s975_s26 = smov 32   ;;  %s976_s22 = smov 2  }
  0x1d   : > { %p232_p2 = scmp.lt.s32.totalorder %s973_s20, 3  ;;  %s671_s6 = sshll.u32 %s969_s19, 1 }
  0x1e   : > { %s223_s25 = scalar_lea.hbm %s1272_s1, %s671_s6  ;;  %s215_s23 = scalar_lea.sflag [#allocation6], %s191_s5 }
  0x1f   : > { %s201_s10 = scalar_lea.hbm %s1284_s0, %s686_s7  ;;  %s670_s7 = sshll.u32 %s191_s5, 1 }
  0x20   : > { %s202_s13 = sshll.u32 %s201_s10, 4  ;;  %p233_p3 = pnand %p672_p1, %p232_p2  ;;  %s203_s13 = int_to_ptr.hbm [resolvable:$true] %s202_s13 }
  0x21   : > { %700 = dma.hbm_to_vmem [thread:$0]  (!%p1080_p0), %s203_s13, 128, %s205_s12, %s192_s24, %s975_s26, %s975_s26, %s976_s22  }
  0x22   : > { %s218_s10 = scalar_lea.vmem [#allocation5], %s670_s7  ;;  %s225_s0 = sshll.u32 %s223_s25, 4  ;;  %s226_s0 = int_to_ptr.hbm [resolvable:$true] %s225_s0 }
  0x23   : > { %s227_s11 = sshll.u32 %s218_s10, 4  ;;  %236 = sbr.rel (%p233_p3) target bundleno = 97 (0x61), region = 28  ;;  %s228_s11 = int_to_ptr.vmem [resolvable:$true] %s227_s11 }
  0x24   : > { %703 = dma.hbm_to_vmem [thread:$0]  (!%p1080_p0), %s226_s0, 32, %s228_s11, %s215_s23  }
  0x25   : > { %s1095_s22 = sand.u32 (!%p233_p3), 1, %s957_s16  }
  0x26   : > { %s673_s12 = sshll.u32 (!%p233_p3), %s1095_s22, 3  ;;  %s239_s13 = scalar_lea.sflag (!%p233_p3), [#allocation3], %s1095_s22 }
  0x27   : > { %s242_s24 = scalar_lea.vmem (!%p233_p3), [#allocation2], %s673_s12 }
  0x28   : > { %936 = dma.done.wait (%p1054_p8), %s239_s13, 128  }
  0x29   : > { %938 = vsyncadd (%p1054_p8), %s239_s13, 4294967168  ;;  %s674_s5 = sshll.u32 %s1095_s22, 1  ;;  %s249_s0 = scalar_lea.sflag [#allocation6], %s1095_s22 }
  0x2a   : > { %s252_s23 = scalar_lea.vmem [#allocation5], %s674_s5 }
  0x2b   : > { %940 = dma.done.wait (%p1054_p8), %s249_s0, 32  }
  0x2c   : > { %942 = vsyncadd (%p1054_p8), %s249_s0, 4294967264  ;;  %s675_s14 = sshll.u32 %s1095_s22, 2  ;;  %v977_v0 = vmov 0.0   ;;  %vm313_vm0 = vcmask 1041408   ;;  %v300_v1 = vld [vmem:[%s242_s24] sm:$0x3] }
  0x2d   : > { %s1110_s26 = scalar_lea.vmem [#allocation8], %s675_s14  ;;  %s1114_s7 = scalar_lea.vmem [#allocation7], %s675_s14  ;;  %v301_v2 = vld [vmem:[%s242_s24 + $0x2] sm:$0x3]  ;;  %v302_v3 = vld [vmem:[%s242_s24 + $0x4] sm:$0x3]  ;;  %v342_v5 = vmul.f32 %v300_v1, %v300_v1 }
  0x2e   : > { %298 = vst [vmem:[%s1110_s26] sm:$0xf] %v977_v0  ;;  %s1118_s6 = scalar_lea.vmem [#allocation10], %s675_s14  ;;  %v303_v4 = vld [vmem:[%s242_s24 + $0x6] sm:$0x3]  ;;  %v343_v6 = vmul.f32 %v301_v2, %v301_v2  ;;  %v344_v7 = vmul.f32 %v302_v3, %v302_v3  ;;  %v1122_v8 = vld [vmem:[%s252_s23] sm:$0x3] }
  0x2f   : > { %297 = vst [vmem:[%s1114_s7] sm:$0xf] %v977_v0  ;;  %v345_v9 = vmul.f32 %v303_v4, %v303_v4  ;;  %vm305_vm1 = vcmp.eq.s32.totalorder %v1122_v8, 0  ;;  %vm306_vm2 = vcmp.eq.s32.totalorder %v1122_v8, 1  ;;  %vm307_vm3 = vcmp.eq.s32.totalorder %v1122_v8, 2  ;;  %s1145_s27 = sshll.u32 %s965_s18, 2  ;;  %s447_s25 = sand.u32 1, %s1034_s21  }
  0x30   : > { %299 = vst [vmem:[%s1118_s6] sm:$0xf] %v977_v0  ;;  %v346_v10 = vsel %vm313_vm0, %v342_v5, 0.0  ;;  %v353_v11 = vsel %vm313_vm0, %v343_v6, 0.0  ;;  %v360_v12 = vsel %vm313_vm0, %v344_v7, 0.0  ;;  %vm308_vm4 = vcmp.eq.s32.totalorder %v1122_v8, 3  ;;  %s477_s18 = scalar_lea.hbm %s1274_s3, %s1145_s27  ;;  %s479_s10 = sshll.u32 %s1110_s26, 4  ;;  %s1175_s10 = int_to_ptr.vmem [resolvable:$true] %s479_s10 }
  0x31   : > { %v347_v13 = vrot.slane %v346_v10, 4  ;;  %v354_v14 = vrot.slane %v353_v11, 4  ;;  %v361_v15 = vrot.slane %v360_v12, 4  ;;  %v367_v16 = vsel %vm313_vm0, %v345_v9, 0.0  ;;  %s1161_s11 = sshll.u32 %s477_s18, 4  ;;  %s463_s24 = scalar_lea.hbm %s1273_s2, %s1145_s27  ;;  %s482_s11 = int_to_ptr.hbm [resolvable:$true] %s1161_s11 }
  0x32   : > { %v368_v17 = vrot.slane %v367_v16, 4  ;;  %vm411_vm5 = vcmask 1041409   ;;  %v309_v18 = vsel %vm305_vm1, %v300_v1, 0.0  ;;  %v310_v19 = vsel %vm306_vm2, %v301_v2, 0.0  ;;  %s465_s5 = sshll.u32 %s1114_s7, 4  ;;  %s1186_s0 = sshll.u32 %s463_s24, 4  ;;  %s466_s5 = int_to_ptr.vmem [resolvable:$true] %s465_s5  ;;  %s468_s0 = int_to_ptr.hbm [resolvable:$true] %s1186_s0 }
  0x33   : > { %v311_v20 = vsel %vm307_vm3, %v302_v3, 0.0  ;;  %v348_v21 = vadd.f32 %v347_v13, %v346_v10  ;;  %v355_v22 = vadd.f32 %v354_v14, %v353_v11  ;;  %v362_v23 = vadd.f32 %v361_v15, %v360_v12  ;;  %s1191_s23 = scalar_lea.sflag [#allocation9], %s447_s25  ;;  %s841_s14 = sshra.s32 %s482_s11, 4  ;;  %s842_s14 = int_to_ptr.hbm [resolvable:$true] %s841_s14 }
  0x34   : > { %vm413_vm6 = vcmask 1042434   ;;  %v312_v24 = vsel %vm308_vm4, %v303_v4, 0.0  ;;  %v369_v25 = vadd.f32 %v368_v17, %v367_v16  ;;  %vm415_vm7 = vcmask 1043459   ;;  %s843_s8 = scalar_lea.hbm %s842_s14, 4  ;;  %s847_s18 = scalar_lea.hbm %s1274_s3, 8 }
  0x35   : > { %v314_v26 = vsel %vm313_vm0, %v309_v18, 0.0  ;;  %v321_v27 = vsel %vm313_vm0, %v310_v19, 0.0  ;;  %v328_v28 = vsel %vm313_vm0, %v311_v20, 0.0  ;;  %v349_v29 = vrot.slane %v348_v21, 2  ;;  %v420_v61 = vld [vmem:[%s1110_s26] sm:$0xf]  ;;  %p844_p4 = scmp.ne.s32.totalorder %s842_s14, %s843_s8  ;;  %p848_p7 = scmp.lt.s32.totalorder %s842_s14, %s1274_s3 }
  0x36   : > { %v356_v30 = vrot.slane %v355_v22, 2  ;;  %v363_v31 = vrot.slane %v362_v23, 2  ;;  %v315_v32 = vrot.slane %v314_v26, 4  ;;  %v370_v33 = vrot.slane %v369_v25, 2  ;;  %v406_v19 = vld [vmem:[%s1114_s7] sm:$0xf]  ;;  %p849_p8 = scmp.lt.s32.totalorder %s847_s18, %s843_s8 }
  0x37   : > { %v322_v34 = vrot.slane %v321_v27, 4  ;;  %v329_v35 = vrot.slane %v328_v28, 4  ;;  %v335_v36 = vsel %vm313_vm0, %v312_v24, 0.0  ;;  %v350_v37 = vadd.f32 %v349_v29, %v348_v21  ;;  %p845_p5 = pnand %p844_p4, %p1058_p9 }
  0x38   : > { %v357_v38 = vadd.f32 %v356_v30, %v355_v22  ;;  %v364_v39 = vadd.f32 %v363_v31, %v362_v23  ;;  %v316_v40 = vadd.f32 %v315_v32, %v314_v26  ;;  %v371_v41 = vadd.f32 %v370_v33, %v369_v25  ;;  %p850_p10 = por %p849_p8, %p848_p7 }
  0x39   : > { %v323_v42 = vadd.f32 %v322_v34, %v321_v27  ;;  %v330_v43 = vadd.f32 %v329_v35, %v328_v28  ;;  %v336_v44 = vrot.slane %v335_v36, 4  ;;  %v351_v45 = vrot.slane %v350_v37, 1  ;;  %p846_p6 = pneg %p845_p5 }
  0x3a   : > { %v358_v46 = vrot.slane %v357_v38, 1  ;;  %v365_v47 = vrot.slane %v364_v39, 1  ;;  %v317_v48 = vrot.slane %v316_v40, 2  ;;  %v372_v49 = vrot.slane %v371_v41, 1 }
  0x3b   : > { %v324_v50 = vrot.slane %v323_v42, 2  ;;  %v331_v51 = vrot.slane %v330_v43, 2  ;;  %v337_v52 = vadd.f32 %v336_v44, %v335_v36  ;;  %v352_v53 = vadd.f32 %v351_v45, %v350_v37  ;;  %p851_p13 = pnand %p850_p10, %p846_p6 }
  0x3c   : > { %v359_v54 = vadd.f32 %v358_v46, %v357_v38  ;;  %v366_v55 = vadd.f32 %v365_v47, %v364_v39  ;;  %v318_v56 = vadd.f32 %v317_v48, %v316_v40  ;;  %v373_v57 = vadd.f32 %v372_v49, %v371_v41 }
  0x3d   : > { %v325_v58 = vadd.f32 %v324_v50, %v323_v42  ;;  %v332_v59 = vadd.f32 %v331_v51, %v330_v43  ;;  %v338_v60 = vrot.slane %v337_v52, 2  ;;  %v374_v1 = vsel %vm305_vm1, 1.0, %v977_v0 }
  0x3e   : > { %v425_v62 = vsel %vm411_vm5, %v359_v54, %v352_v53  ;;  %v319_v63 = vrot.slane %v318_v56, 1  ;;  %v375_v2 = vsel %vm306_vm2, 1.0, %v977_v0  ;;  %v376_v10 = vsel %vm307_vm3, 1.0, %v977_v0 }
  0x3f   : > { %v426_v3 = vsel %vm413_vm6, %v366_v55, %v425_v62  ;;  %v326_v4 = vrot.slane %v325_v58, 1  ;;  %v333_v5 = vrot.slane %v332_v59, 1  ;;  %v339_v6 = vadd.f32 %v338_v60, %v337_v52 }
  0x40   : > { %v427_v7 = vsel %vm415_vm7, %v373_v57, %v426_v3  ;;  %v320_v9 = vadd.f32 %v319_v63, %v318_v56  ;;  %v377_v11 = vsel %vm308_vm4, 1.0, %v977_v0  ;;  %v378_v16 = vsel %vm313_vm0, %v374_v1, 0.0 }
  0x41   : > { %v429_v12 = vadd.f32 %v427_v7, %v420_v61  ;;  %v327_v13 = vadd.f32 %v326_v4, %v325_v58  ;;  %v334_v14 = vadd.f32 %v333_v5, %v332_v59  ;;  %v340_v15 = vrot.slane %v339_v6, 1 }
  0x42   : > { %v385_v17 = vsel %vm313_vm0, %v375_v2, 0.0  ;;  %v392_v8 = vsel %vm313_vm0, %v376_v10, 0.0  ;;  %v399_v0 = vsel %vm313_vm0, %v377_v11, 0.0  ;;  %v379_v21 = vrot.slane %v378_v16, 4 }
  0x43   : > { %430 = vst [vmem:[%s1110_s26] sm:$0xf] %v429_v12  ;;  %v341_v18 = vadd.f32 %v340_v15, %v339_v6  ;;  %v412_v20 = vsel %vm411_vm5, %v327_v13, %v320_v9  ;;  %v386_v22 = vrot.slane %v385_v17, 4  ;;  %v393_v24 = vrot.slane %v392_v8, 4 }
  0x44   : > { %v414_v23 = vsel %vm413_vm6, %v334_v14, %v412_v20  ;;  %v400_v25 = vrot.slane %v399_v0, 4 }
  0x45   : > { %854 = shalt.err (!%p851_p13)
}
  0x46   : > { %692 = dma.vmem_to_hbm [thread:$0]  (%p1058_p9), %s1175_s10, 64, %s482_s11, %s1191_s23   ;;  %v416_v26 = vsel %vm415_vm7, %v341_v18, %v414_v23  ;;  %v380_v27 = vadd.f32 %v379_v21, %v378_v16  ;;  %v387_v28 = vadd.f32 %v386_v22, %v385_v17  ;;  %v394_v30 = vadd.f32 %v393_v24, %v392_v8 }
  0x47   : > { %v418_v29 = vadd.f32 %v416_v26, %v406_v19  ;;  %v401_v31 = vadd.f32 %v400_v25, %v399_v0  ;;  %s443_s21 = scalar_lea.sflag [#allocation4], %s1095_s22  ;;  %s869_s25 = sshra.s32 %s468_s0, 4  ;;  %s870_s25 = int_to_ptr.hbm [resolvable:$true] %s869_s25 }
  0x48   : > { %v381_v32 = vrot.slane %v380_v27, 2  ;;  %v388_v33 = vrot.slane %v387_v28, 2  ;;  %v395_v34 = vrot.slane %v394_v30, 2  ;;  %s871_s10 = scalar_lea.hbm %s870_s25, 4  ;;  %s875_s14 = scalar_lea.hbm %s1273_s2, 8 }
  0x49   : > { %419 = vst [vmem:[%s1114_s7] sm:$0xf] %v418_v29  ;;  %v402_v35 = vrot.slane %v401_v31, 2  ;;  %p872_p0 = scmp.ne.s32.totalorder %s870_s25, %s871_s10  ;;  %p876_p3 = scmp.lt.s32.totalorder %s870_s25, %s1273_s2 }
  0x4a   : > { %v382_v36 = vadd.f32 %v381_v32, %v380_v27  ;;  %v389_v37 = vadd.f32 %v388_v33, %v387_v28  ;;  %p877_p4 = scmp.lt.s32.totalorder %s875_s14, %s871_s10 }
  0x4b   : > { %p873_p1 = pnand %p872_p0, %p1058_p9 }
  0x4c   : > { %p878_p5 = por %p877_p4, %p876_p3 }
  0x4d   : > { %p874_p2 = pneg %p873_p1 }
  0x4f   : > { %p879_p6 = pnand %p878_p5, %p874_p2 }
  0x51   : > { %882 = shalt.err (!%p879_p6)
}
  0x52   : > { %691 = dma.vmem_to_hbm [thread:$0]  (%p1058_p9), %s466_s5, 64, %s468_s0, %s443_s21   ;;  %v396_v38 = vadd.f32 %v395_v34, %v394_v30  ;;  %v403_v39 = vadd.f32 %v402_v35, %v401_v31  ;;  %v383_v40 = vrot.slane %v382_v36, 1  ;;  %v390_v41 = vrot.slane %v389_v37, 1  ;;  %v431_v48 = vld [vmem:[%s1118_s6] sm:$0xf] }
  0x53   : > { %s491_s9 = scalar_lea.hbm %s1275_s4, %s1145_s27  ;;  %s493_s18 = sshll.u32 %s1118_s6, 4  ;;  %s494_s18 = int_to_ptr.vmem [resolvable:$true] %s493_s18 }
  0x54   : > { %v397_v42 = vrot.slane %v396_v38, 1  ;;  %v404_v43 = vrot.slane %v403_v39, 1  ;;  %v384_v44 = vadd.f32 %v383_v40, %v382_v36  ;;  %v391_v45 = vadd.f32 %v390_v41, %v389_v37  ;;  %s495_s5 = sshll.u32 %s491_s9, 4  ;;  %s903_s21 = scalar_lea.hbm %s1275_s4, 8  ;;  %s496_s5 = int_to_ptr.hbm [resolvable:$true] %s495_s5 }
  0x55   : > { %s897_s0 = sshra.s32 %s496_s5, 4  ;;  %s898_s0 = int_to_ptr.hbm [resolvable:$true] %s897_s0 }
  0x56   : > { %v398_v46 = vadd.f32 %v397_v42, %v396_v38  ;;  %v405_v47 = vadd.f32 %v404_v43, %v403_v39  ;;  %v436_v49 = vsel %vm411_vm5, %v391_v45, %v384_v44  ;;  %s899_s27 = scalar_lea.hbm %s898_s0, 4  ;;  %p904_p13 = scmp.lt.s32.totalorder %s898_s0, %s1275_s4 }
  0x57   : > { %p900_p7 = scmp.ne.s32.totalorder %s898_s0, %s899_s27  ;;  %p905_p0 = scmp.lt.s32.totalorder %s903_s21, %s899_s27 }
  0x58   : > { %v437_v50 = vsel %vm413_vm6, %v398_v46, %v436_v49 }
  0x59   : > { %v438_v51 = vsel %vm415_vm7, %v405_v47, %v437_v50  ;;  %p901_p8 = pnand %p900_p7, %p1058_p9  ;;  %p906_p1 = por %p905_p0, %p904_p13 }
  0x5a   : > { %v440_v52 = vadd.f32 %v438_v51, %v431_v48 }
  0x5b   : > { %p902_p10 = pneg %p901_p8 }
  0x5c   : > { %441 = vst [vmem:[%s1118_s6] sm:$0xf] %v440_v52 }
  0x5d   : > { %p907_p2 = pnand %p906_p1, %p902_p10 }
  0x5f   : > { %910 = shalt.err (!%p907_p2)
}
  0x60   : > { %693 = dma.vmem_to_hbm [thread:$0]  (%p1058_p9), %s494_s18, 64, %s496_s5, %s1191_s23  }
  0x61 PF: > { %s507_s6 = sand.u32 1, %s953_s15   ;;  %p705_p3 = pnand %p666_p12, %p1067_p11 }
  0x62   : > { %s508_s11 = scalar_lea.sflag [#allocation4], %s507_s6 }
  0x63   : > { %p706_p4 = pneg %p705_p3 }
  0x65   : > { %944 = dma.done.wait (%p706_p4), %s508_s11, 64  }
  0x66   : > { %946 = vsyncadd (%p706_p4), %s508_s11, 4294967232  ;;  %s1286_s24 = sadd.s32 4294967294, %s973_s20  }
  0x67   : > { %s517_s14 = sand.u32 1, %s1286_s24  }
  0x68   : > { %s518_s8 = scalar_lea.sflag [#allocation9], %s517_s14 }
  0x69   : > { %948 = dma.done.wait (%p706_p4), %s518_s8, 128  }
  0x6a   : > { %950 = vsyncadd (%p706_p4), %s518_s8, 4294967168  ;;  %s27_s20 = sadd.s32 1, %s973_s20   ;;  %s1287_s28 = sld [smem:[#allocation15_spill]] }
  0x6b   : > { %p24_p9 = scmp.ge.s32.totalorder %s27_s20, 4   ;;  %s1288_s15 = smov %s957_s16 }
  0x6c   : > { %s1289_s16 = smov %s961_s17  ;;  %s1290_s17 = smov %s1065_s29 }
  0x6d   : > { %s1291_s18 = smov %s969_s19  ;;  %26 = sbr.rel (!%p24_p9) target bundleno = 12 (0xc), region = 122 }
  0x70   : > { %s1292_s19 = smov %s1287_s28 }
  0x72   :  { %534 = vsyncpa [#allocation3], 1 }
  0x73   :  { %536 = vsyncpa [#allocation3 + $0x1], 1 }
  0x74   :  { %537 = vsyncpa [#allocation6], 1 }
  0x75   :  { %539 = vsyncpa [#allocation6 + $0x1], 1 }
  0x76   :  { %540 = vsyncpa [#allocation4], 1 }
  0x77   :  { %542 = vsyncpa [#allocation4 + $0x1], 1 }
  0x78   :  { %543 = vsyncpa [#allocation9], 1 }
  0x79   :  { %545 = vsyncpa [#allocation9 + $0x1], 1 }

</bundles_post_ra>
